<compile_context>
chip_gen: v7x
topology: tpu7x:2x2x1
jax: 0.10.0
libtpu: 0.0.40
codegen_flags: <defaults>
</compile_context>

<pallas_src>
import functools

import jax
import jax.numpy as jnp
from jax import lax
from jax.experimental import pallas as pl
from jax.experimental.pallas import tpu as pltpu

_LANE = 128


def _round_up(v, m):
    return ((v + m - 1) // m) * m


def _fast_reciprocal(x):
    # EUP reciprocal approximation + one Newton-Raphson step: keeps the divide
    # off the VPU's long divide sequence while restoring ~f32 accuracy.
    y = pl.reciprocal(x, approx=True)
    return y * (2.0 - x * y)


def _rational_hat_kernel(x_ref, c_ref, r_ref, o_ref, *, input_dim):
    # x_ref: (S, D, STRIP)   c_ref: (BO, D)   r_ref: (BO, 1)   o_ref: (S, BO, STRIP)
    strips_per_tile, _block_o, _strip = o_ref.shape

    c = c_ref[...].astype(jnp.float32)                    # (BO, D), tiny
    r1 = 1.0 + jnp.abs(r_ref[...].astype(jnp.float32))    # (BO, 1); folds 2nd "+1"

    def body(s, carry):
        x_s = x_ref[s].astype(jnp.float32)                # (D, STRIP)
        # norm1 = 1 + sum_d |x[d, :] - c[:, d]|  (seed with d=0 folds the "1+")
        norm1 = 1.0 + jnp.abs(x_s[0:1, :] - c[:, 0:1])    # (BO, STRIP)
        for d in range(1, input_dim):                     # D is tiny & static
            norm1 = norm1 + jnp.abs(x_s[d:d + 1, :] - c[:, d:d + 1])
        den2 = 1.0 + jnp.abs(r1 - norm1)
        # 1/norm1 - 1/den2 == (den2 - norm1) * 1/(norm1*den2): one EUP recip,
        # exact numerator (no cancellation of two near-equal reciprocals).
        out = (den2 - norm1) * _fast_reciprocal(norm1 * den2)
        o_ref[s] = out.astype(o_ref.dtype)
        return carry

    # fori_loop (not a Python for) bounds the per-strip vreg live ranges.
    lax.fori_loop(0, strips_per_tile, body, 0)


def rational_hat_transform(x, c_param, r_param, *, block_n=8192, strip=256,
                           block_o_max=256):
    """x: [N, input_dim] -> [N, output_dim] (matches the PyTorch forward)."""
    n, input_dim = x.shape
    c_in, output_dim = c_param.shape
    assert c_in == input_dim
    assert r_param.shape == (1, output_dim)

    # ---- output_dim (sublane) blocking -------------------------------------
    if output_dim <= block_o_max:
        block_o = output_dim
    else:
        block_o = output_dim                 # fallback: whole O (always legal)
        for cand in range((block_o_max // 8) * 8, 7, -8):
            if output_dim % cand == 0:
                block_o = cand
                break
    grid_o = output_dim // block_o

    # ---- N (lane) tiling ----------------------------------------------------
    # Big tiles amortize per-grid-step overhead; cap so there are at least two
    # N-blocks whenever N allows (keeps both v7x TensorCores busy).
    tile_n = _round_up(max(_LANE, min(block_n, n)), _LANE)
    if n > _LANE:
        tile_n = min(tile_n, _round_up(pl.cdiv(n, 2), _LANE))
    # In-kernel strip width (bounds live ranges); tile_n must be a multiple.
    strip = max(_LANE, min(_round_up(strip, _LANE), tile_n))
    tile_n = _round_up(tile_n, strip)

    # Keep double-buffered blocks comfortably inside every chip's scoped VMEM.
    budget = 24 * 1024 * 1024

    def _vmem_est(tn):
        return 2 * 4 * (tn * (block_o + input_dim) + block_o * (input_dim + 1))

    while _vmem_est(tile_n) > budget and tile_n > strip:
        tile_n = max(strip, _round_up(tile_n // 2, strip))

    n_pad = _round_up(n, tile_n)
    grid_n = n_pad // tile_n
    strips_per_tile = tile_n // strip
    k_strips = n_pad // strip

    # ---- operands in the strip-major, lane-dense compute layout -------------
    # x3[k, d, l] = x[k*strip + l, d]; padded rows read zeros (denominators are
    # >= 1, so padding is numerically inert) and are sliced off below.
    x_t = jnp.transpose(x)                                        # (D, N)
    if n_pad != n:
        x_t = jnp.pad(x_t, ((0, 0), (0, n_pad - n)))
    x3 = x_t.reshape(input_dim, k_strips, strip).transpose(1, 0, 2)   # (K, D, STRIP)
    c_t = jnp.transpose(c_param)                                  # (O, D)
    r_t = jnp.transpose(r_param)                                  # (O, 1)

    kernel = functools.partial(_rational_hat_kernel, input_dim=input_dim)

    out3 = pl.pallas_call(
        kernel,
        out_shape=jax.ShapeDtypeStruct((k_strips, output_dim, strip), x.dtype),
        grid_spec=pltpu.PrefetchScalarGridSpec(
            num_scalar_prefetch=0,
            grid=(grid_n, grid_o),
            in_specs=[
                # x blocks depend only on the outer (N) axis -> stay resident
                # across the inner O loop; c/r are tiny and re-fetched per step.
                pl.BlockSpec((strips_per_tile, input_dim, strip),
                             lambda i, j: (i, 0, 0)),
                pl.BlockSpec((block_o, input_dim), lambda i, j: (j, 0)),
                pl.BlockSpec((block_o, 1), lambda i, j: (j, 0)),
            ],
            out_specs=pl.BlockSpec((strips_per_tile, block_o, strip),
                                   lambda i, j: (i, j, 0)),
        ),
        compiler_params=pltpu.CompilerParams(
            dimension_semantics=("parallel", "parallel"),
            vmem_limit_bytes=32 * 1024 * 1024,
        ),
    )(x3, c_t, r_t)

    # Back to the module's [N, O] layout (one fused XLA copy; a layout-aware
    # consumer could take the kernel output directly and skip this pass).
    out = jnp.transpose(out3, (0, 2, 1)).reshape(n_pad, output_dim)
    return out[:n]


def rational_hat_reference(x, c_param, r_param):
    # Pure-JAX reference mirroring the PyTorch forward.
    diff = x[:, :, None] - c_param[None, :, :]          # (N, D, O)
    norm = jnp.sum(jnp.abs(diff), axis=1)               # (N, O)
    return 1.0 / (1.0 + norm) - 1.0 / (1.0 + jnp.abs(jnp.abs(r_param) - norm))


if __name__ == "__main__":
    key = jax.random.PRNGKey(0)
    k_x, k_c, k_r = jax.random.split(key, 3)

    # N deliberately not a multiple of the tile width (exercises padding) and
    # large enough to give two parallel N-blocks (v7x dual-TC path).
    N, input_dim, output_dim = 1000, 4, 32

    x = jax.random.normal(k_x, (N, input_dim), dtype=jnp.float32)
    # Deterministic synthetic parameters (matching __init__ shapes & scale).
    c_param = jax.random.normal(k_c, (input_dim, output_dim), dtype=jnp.float32) * 0.1
    r_param = jax.random.normal(k_r, (1, output_dim), dtype=jnp.float32) * 0.1

    out = rational_hat_transform(x, c_param, r_param)
    out = jax.block_until_ready(out)

    ref = rational_hat_reference(x, c_param, r_param)
    assert out.shape == (N, output_dim)
    assert jnp.allclose(out, ref, atol=1e-4, rtol=1e-4), "mismatch vs reference"

    print("KERNEL_OK")
</pallas_src>

<mosaic_0001>
module attributes {stable_mosaic.version = 11 : i64} {
  func.func @_rational_hat_kernel(%arg0: i32, %arg1: i32, %arg2: memref<2x4x256xf32, #tpu.memory_space<vmem>>, %arg3: memref<32x4xf32, #tpu.memory_space<vmem>>, %arg4: memref<32x1xf32, #tpu.memory_space<vmem>>, %arg5: memref<2x32x256xf32, #tpu.memory_space<vmem>>) attributes {dimension_semantics = [#tpu.dimension_semantics<parallel>, #tpu.dimension_semantics<parallel>], iteration_bounds = array<i64: 2, 1>, scalar_prefetch = 0 : i64, scratch_operands = 0 : i64, tpu.core_type = #tpu.core_type<tc>, window_params = [{transform_indices = @transform_0, window_bounds = array<i64: 2, 4, 256>}, {transform_indices = @transform_1, window_bounds = array<i64: 32, 4>}, {transform_indices = @transform_2, window_bounds = array<i64: 32, 1>}, {transform_indices = @transform_3, window_bounds = array<i64: 2, 32, 256>}]} {
    %c0 = arith.constant 0 : index
    %c0_0 = arith.constant 0 : index
    %0 = vector.load %arg3[%c0, %c0_0] : memref<32x4xf32, #tpu.memory_space<vmem>>, vector<32x4xf32>
    %c0_1 = arith.constant 0 : index
    %c0_2 = arith.constant 0 : index
    %1 = vector.load %arg4[%c0_1, %c0_2] : memref<32x1xf32, #tpu.memory_space<vmem>>, vector<32x1xf32>
    %2 = math.absf %1 : vector<32x1xf32>
    %cst = arith.constant 1.000000e+00 : f32
    %3 = vector.broadcast %cst : f32 to vector<32x1xf32>
    %4 = arith.addf %3, %2 : vector<32x1xf32>
    %c0_i32 = arith.constant 0 : i32
    %c2_i32 = arith.constant 2 : i32
    %5 = arith.addi %c0_i32, %c2_i32 : i32
    %c1_i32 = arith.constant 1 : i32
    scf.for %arg6 = %c0_i32 to %5 step %c1_i32  : i32 {
      %6 = arith.index_cast %arg6 : i32 to index
      %c0_4 = arith.constant 0 : index
      %c0_5 = arith.constant 0 : index
      %7 = vector.load %arg2[%6, %c0_4, %c0_5] : memref<2x4x256xf32, #tpu.memory_space<vmem>>, vector<1x4x256xf32>
      %8 = vector.shape_cast %7 : vector<1x4x256xf32> to vector<4x256xf32>
      %9 = vector.extract_strided_slice %8 {offsets = [0, 0], sizes = [1, 256], strides = [1, 1]} : vector<4x256xf32> to vector<1x256xf32>
      %10 = vector.extract_strided_slice %0 {offsets = [0, 0], sizes = [32, 1], strides = [1, 1]} : vector<32x4xf32> to vector<32x1xf32>
      %11 = vector.broadcast %9 : vector<1x256xf32> to vector<32x256xf32>
      %12 = vector.broadcast %10 : vector<32x1xf32> to vector<32x256xf32>
      %13 = arith.subf %11, %12 : vector<32x256xf32>
      %14 = math.absf %13 : vector<32x256xf32>
      %cst_6 = arith.constant 1.000000e+00 : f32
      %15 = vector.broadcast %cst_6 : f32 to vector<32x256xf32>
      %16 = arith.addf %15, %14 : vector<32x256xf32>
      %17 = vector.extract_strided_slice %8 {offsets = [1, 0], sizes = [1, 256], strides = [1, 1]} : vector<4x256xf32> to vector<1x256xf32>
      %18 = vector.extract_strided_slice %0 {offsets = [0, 1], sizes = [32, 1], strides = [1, 1]} : vector<32x4xf32> to vector<32x1xf32>
      %19 = vector.broadcast %17 : vector<1x256xf32> to vector<32x256xf32>
      %20 = vector.broadcast %18 : vector<32x1xf32> to vector<32x256xf32>
      %21 = arith.subf %19, %20 : vector<32x256xf32>
      %22 = math.absf %21 : vector<32x256xf32>
      %23 = arith.addf %16, %22 : vector<32x256xf32>
      %24 = vector.extract_strided_slice %8 {offsets = [2, 0], sizes = [1, 256], strides = [1, 1]} : vector<4x256xf32> to vector<1x256xf32>
      %25 = vector.extract_strided_slice %0 {offsets = [0, 2], sizes = [32, 1], strides = [1, 1]} : vector<32x4xf32> to vector<32x1xf32>
      %26 = vector.broadcast %24 : vector<1x256xf32> to vector<32x256xf32>
      %27 = vector.broadcast %25 : vector<32x1xf32> to vector<32x256xf32>
      %28 = arith.subf %26, %27 : vector<32x256xf32>
      %29 = math.absf %28 : vector<32x256xf32>
      %30 = arith.addf %23, %29 : vector<32x256xf32>
      %31 = vector.extract_strided_slice %8 {offsets = [3, 0], sizes = [1, 256], strides = [1, 1]} : vector<4x256xf32> to vector<1x256xf32>
      %32 = vector.extract_strided_slice %0 {offsets = [0, 3], sizes = [32, 1], strides = [1, 1]} : vector<32x4xf32> to vector<32x1xf32>
      %33 = vector.broadcast %31 : vector<1x256xf32> to vector<32x256xf32>
      %34 = vector.broadcast %32 : vector<32x1xf32> to vector<32x256xf32>
      %35 = arith.subf %33, %34 : vector<32x256xf32>
      %36 = math.absf %35 : vector<32x256xf32>
      %37 = arith.addf %30, %36 : vector<32x256xf32>
      %38 = vector.broadcast %4 : vector<32x1xf32> to vector<32x256xf32>
      %39 = arith.subf %38, %37 : vector<32x256xf32>
      %40 = math.absf %39 : vector<32x256xf32>
      %cst_7 = arith.constant 1.000000e+00 : f32
      %41 = vector.broadcast %cst_7 : f32 to vector<32x256xf32>
      %42 = arith.addf %41, %40 : vector<32x256xf32>
      %43 = arith.subf %42, %37 : vector<32x256xf32>
      %44 = arith.mulf %37, %42 : vector<32x256xf32>
      %45 = tpu.reciprocal %44 {approx = true} : vector<32x256xf32> -> vector<32x256xf32>
      %46 = arith.mulf %44, %45 : vector<32x256xf32>
      %cst_8 = arith.constant 2.000000e+00 : f32
      %47 = vector.broadcast %cst_8 : f32 to vector<32x256xf32>
      %48 = arith.subf %47, %46 : vector<32x256xf32>
      %49 = arith.mulf %45, %48 : vector<32x256xf32>
      %50 = arith.mulf %43, %49 : vector<32x256xf32>
      %51 = arith.index_cast %arg6 : i32 to index
      %c0_9 = arith.constant 0 : index
      %c0_10 = arith.constant 0 : index
      %52 = vector.load %arg5[%51, %c0_9, %c0_10] : memref<2x32x256xf32, #tpu.memory_space<vmem>>, vector<1x32x256xf32>
      %53 = vector.shape_cast %52 : vector<1x32x256xf32> to vector<32x256xf32>
      %54 = vector.shape_cast %50 : vector<32x256xf32> to vector<1x32x256xf32>
      tpu.vector_store %arg5[%51, %c0_9, %c0_10], %54 {strides = array<i32>} : memref<2x32x256xf32, #tpu.memory_space<vmem>>, vector<1x32x256xf32>,
    }
    %c2_i32_3 = arith.constant 2 : i32
    return
  }
  func.func @transform_0(%arg0: i32, %arg1: i32) -> (i32, i32, i32) {
    %c0_i32 = arith.constant 0 : i32
    %c0_i32_0 = arith.constant 0 : i32
    %c0_i32_1 = arith.constant 0 : i32
    return %arg0, %c0_i32, %c0_i32_0 : i32, i32, i32
  }
  func.func @transform_1(%arg0: i32, %arg1: i32) -> (i32, i32) {
    %c0_i32 = arith.constant 0 : i32
    %c0_i32_0 = arith.constant 0 : i32
    return %arg1, %c0_i32 : i32, i32
  }
  func.func @transform_2(%arg0: i32, %arg1: i32) -> (i32, i32) {
    %c0_i32 = arith.constant 0 : i32
    %c0_i32_0 = arith.constant 0 : i32
    return %arg1, %c0_i32 : i32, i32
  }
  func.func @transform_3(%arg0: i32, %arg1: i32) -> (i32, i32, i32) {
    %c0_i32 = arith.constant 0 : i32
    %c0_i32_0 = arith.constant 0 : i32
    return %arg0, %arg1, %c0_i32 : i32, i32, i32
  }
}

</mosaic_0001>

<bundles_post_ra>
// kernel: tpu_custom_call.1
= control target key start
LH: loop header
LB: loop body
LE: loop exit
PB: predicated region body
PF: predicated region fallthrough
CT: control target
= control target key end

     0   :  { %8 = vsyncpa [#allocation3], 0  ;;  %s1266_s0 = inlined_call_operand.vmem [shape: f32[4,4,256], index: 0, kind: input, shape index: {}]   ;;  %s1267_s1 = inlined_call_operand.vmem [shape: f32[32,4], index: 1, kind: input, shape index: {}]   ;;  %s1268_s2 = inlined_call_operand.vmem [shape: f32[32,1], index: 2, kind: input, shape index: {}]   ;;  %s1269_s3 = inlined_call_operand.hbm [shape: f32[4,32,256], index: 3, kind: output, shape index: {}]  }
   0x1   :  { %10 = vsyncpa [#allocation3 + $0x1], 0  ;;  %s974_s12 = smov 0   ;;  %s976_s13 = smov 0  }
   0x2   :  { %s978_s14 = smov 0   ;;  %s980_s15 = smov 0  }
   0x3   :  { %s982_s16 = smov 0   ;;  %s984_s17 = smov 0  }
   0x4 LB: > { %s738_s18 = sadd.s32 4294967295, %s941_s17   ;;  %s739_s19 = sadd.s32 4294967294, %s941_s17   ;;  %s941_s17 = sphi %s984_s17, %s16_s17   ;;  %s937_s16 = sphi %s982_s16, %s1276_s16   ;;  %s933_s15 = sphi %s980_s15, %s1275_s15   ;;  %s929_s14 = sphi %s978_s14, %s1274_s14   ;;  %s925_s13 = sphi %s976_s13, %s1273_s13   ;;  %s921_s12 = sphi %s974_s12, %s1272_s12  }
   0x5   : > { %s28_s20 = sadd.s32 1, %s937_s16  ;;  %s115_s21 = sadd.s32 1, %s929_s14 }
   0x6   : > { %p30_p0 = scmp.ge.s32.totalorder %s28_s20, 2  ;;  %p125_p1 = scmp.ne.s32.totalorder %s929_s14, %s925_s13 }
   0x7   : > { %p126_p2 = scmp.eq.s32.totalorder %s738_s18, 1  ;;  %p131_p3 = scmp.ne.s32.totalorder %s925_s13, %s921_s12 }
   0x8   : > { %s1278_s20 = smov (%p30_p0, %s28_s20), 0  ;;  %p132_p5 = scmp.eq.s32.totalorder %s739_s19, 1 }
   0x9   : > { %p1014_p4 = por %p126_p2, %p125_p1  ;;  %s110_s23 = ssub.s32 %s937_s16, %s1278_s20 }
   0xa   : > { %p744_p6 = scmp.ge.s32.totalorder %s941_s17, 1  ;;  %p113_p7 = scmp.eq.s32.totalorder %s110_s23, 0 }
   0xb   : > { %p1021_p8 = por %p132_p5, %p131_p3  ;;  %p178_p9 = scmp.lt.s32.totalorder %s941_s17, 3 }
   0xc   : > { %s1027_s25 = scalar_select %p113_p7, %s929_s14, %s115_s21  }
   0xd   : > { %p179_p10 = pnand %p744_p6, %p178_p9 }
   0xe   : > { %s210_s26 = sand.u32 (!%p179_p10), 1, %s925_s13   ;;  %s746_s27 = sshll.u32 (!%p179_p10), %s933_s15, 1  ;;  %v1034_v0 = vld [vmem:[%s1267_s1] sm:$0xff] (!%p179_p10)  ;;  %v1039_v1 = vld [vmem:[%s1267_s1 + $0x8] sm:$0xff] (!%p179_p10)  ;;  %v1044_v2 = vld [vmem:[%s1267_s1 + $0x10] sm:$0xff] (!%p179_p10) }
   0xf   : > { %182 = sbr.rel (%p179_p10) target bundleno = 246 (0xf6), region = 32  ;;  %s1048_s7 = sshll.u32 (!%p179_p10), %s210_s26, 7  ;;  %v1053_v3 = vld [vmem:[%s1267_s1 + $0x18] sm:$0xff] (!%p179_p10)  ;;  %v238_v4 = vld [vmem:[%s1268_s2] sm:$0xff] (!%p179_p10)  ;;  %v239_v5 = vld [vmem:[%s1268_s2 + $0x8] sm:$0xff] (!%p179_p10) }
  0x10   : > { %p214_p11 = scmp.lt.s32.totalorder (!%p179_p10), %s746_s27, 3  ;;  %v240_v6 = vld [vmem:[%s1268_s2 + $0x10] sm:$0xff] (!%p179_p10)  ;;  %v241_v7 = vld [vmem:[%s1268_s2 + $0x18] sm:$0xff] (!%p179_p10)  ;;  %v242_v8 = vand.u32 (!%p179_p10), 2147483647, %v238_v4  ;;  %s212_s8 = scalar_lea.vmem (!%p179_p10), [#allocation2], %s1048_s7 }
  0x11   : > { %v243_v9 = vand.u32 (!%p179_p10), 2147483647, %v239_v5  ;;  %v244_v10 = vand.u32 (!%p179_p10), 2147483647, %v240_v6  ;;  %v245_v11 = vand.u32 (!%p179_p10), 2147483647, %v241_v7 }
  0x12   : > { %v1067_v12 = vadd.f32 (!%p179_p10), 1.0, %v242_v8  ;;  %s1081_s9 = smov (!%p179_p10), 0  }
  0x13   : > { %v1069_v13 = vadd.f32 (!%p179_p10), 1.0, %v243_v9  ;;  %v1071_v14 = vadd.f32 (!%p179_p10), 1.0, %v244_v10  ;;  %v1078_v15 = vadd.f32 (!%p179_p10), 1.0, %v245_v11 }
  0x16   : > { %s1280_s27 = smov (!%p214_p11, %s746_s27), 3 }
  0x17   : > { %s759_s30 = sshll.u32 %s1280_s27, 3 }
  0x18   : > { %s1076_s6 = scalar_lea.vmem %s1266_s0, %s759_s30 }
  0x19 LB: >> { %v947_v16 = vmov 0   ;;  %v948_v17 = vmov 1   ;;  %v949_v18 = vmov 2   ;;  %v950_v19 = vmov 3   ;;  %s760_s27 = sshll.u32 %s945_s9, 3  ;;  %s761_s11 = sshll.u32 %s945_s9, 6  ;;  %s945_s9 = sphi %s1081_s9, %s255_s9  }
  0x1a   : >> { %834 = vset.pattern.permute.xlu1 %v947_v16  ;;  %833 = vset.pattern.permute.xlu0 %v947_v16  ;;  %v261_v20 = vlaneseq  ;;  %s258_s10 = scalar_lea.vmem %s1076_s6, %s760_s27  ;;  %s1186_s18 = scalar_lea.vmem %s212_s8, %s761_s11 [#allocation2] }
  0x1b   : >> { %291 = vperm.xlu1 %834, %v1044_v2   ;;  %281 = vperm.xlu0 %833, %v1034_v0   ;;  %v259_v25 = vld [vmem:[%s258_s10] sm:$0xff]  ;;  %s255_s9 = sadd.s32 1, %s945_s9  }
  0x1c   : >> { %v262_v21 = vshrl.u32 %v261_v20, 7  ;;  %p252_p12 = scmp.ge.s32.totalorder %s255_s9, 2  }
  0x1d   : > { %s763_s19 = sshll.u32 (%p252_p12), %s933_s15, 11  ;;  %s626_s29 = sshll.u32 (%p252_p12), %s212_s8, 4  ;;  %s1216_s29 = int_to_ptr.vmem [resolvable:$true] %s626_s29 }
  0x1e   : >> { %v263_v24 = vsub.s32 0, %v262_v21  ;;  %v267_v28 = vsub.s32 4, %v262_v21  ;;  %v325_v30 = vsub.s32 1, %v262_v21  ;;  %v329_v31 = vsub.s32 5, %v262_v21  ;;  %s1212_s28 = scalar_lea.hbm (%p252_p12), %s1269_s3, %s763_s19  ;;  %s1220_s30 = scalar_lea.sflag (%p252_p12), [#allocation3], %s210_s26 }
  0x1f   : >> { %296 = vperm.xlu1 %834, %v1053_v3   ;;  %286 = vperm.xlu0 %833, %v1039_v1   ;;  %v383_v36 = vsub.s32 2, %v262_v21  ;;  %v387_v37 = vsub.s32 6, %v262_v21  ;;  %v441_v40 = vsub.s32 3, %v262_v21  ;;  %v445_v44 = vsub.s32 7, %v262_v21  ;;  %s859_s4 = scalar_lea.vmem (%p252_p12), %s1216_s29, 2048  ;;  %s951_s15 = smov (%p252_p12), [#allocation2]  }
  0x20   : >> { %v264_v29 = vrot.slane %v259_v25, %v263_v24  ;;  %v268_v32 = vrot.slane %v259_v25, %v267_v28  ;;  %v326_v38 = vrot.slane %v259_v25, %v325_v30  ;;  %v330_v39 = vrot.slane %v259_v25, %v329_v31  ;;  %p860_p13 = scmp.ne.s32.totalorder (%p252_p12), %s1216_s29, %s859_s4  ;;  %s863_s5 = sshll.u32 (%p252_p12), %s951_s15, 4  ;;  %s864_s5 = int_to_ptr.vmem [resolvable:$false] %s863_s5 }
  0x21   : >> { %v384_v46 = vrot.slane %v259_v25, %v383_v36  ;;  %v388_v48 = vrot.slane %v259_v25, %v387_v37  ;;  %v442_v52 = vrot.slane %v259_v25, %v441_v40  ;;  %v446_v55 = vrot.slane %v259_v25, %v445_v44  ;;  %s865_s6 = scalar_lea.vmem (%p252_p12), %s864_s5, 4096  ;;  %p866_p2 = scmp.lt.s32.totalorder (%p252_p12), %s1216_s29, %s864_s5 }
  0x22   : >> { %v274_v35 = vrot.slane %v264_v29, %v263_v24  ;;  %v278_v41 = vrot.slane %v268_v32, %v263_v24  ;;  %v336_v50 = vrot.slane %v326_v38, %v325_v30  ;;  %v340_v51 = vrot.slane %v330_v39, %v325_v30  ;;  %p861_p0 = pnand (%p252_p12), %p860_p13, %p1014_p4  ;;  %p867_p3 = scmp.lt.s32.totalorder (%p252_p12), %s865_s6, %s859_s4 }
  0x23   : >> { %836 = vset.pattern.permute.xlu1 %v948_v17  ;;  %835 = vset.pattern.permute.xlu0 %v948_v17  ;;  %v1112_v59 = vrot.slane %v384_v46, %v383_v36  ;;  %v1114_v63 = vrot.slane %v388_v48, %v383_v36  ;;  %v1116_v8 = vrot.slane %v442_v52, %v441_v40 }
  0x24   : >> { %346 = vperm.xlu1 %836, %v1039_v1   ;;  %342 = vperm.xlu0 %835, %v1034_v0   ;;  %p862_p1 = pneg (%p252_p12), %p861_p0  ;;  %p868_p5 = por (%p252_p12), %p867_p3, %p866_p2 }
  0x26   : > { %p869_p6 = pnand (%p252_p12), %p868_p5, %p862_p1 }
  0x28   : >> { %350 = vperm.xlu1 %836, %v1044_v2   ;;  %354 = vperm.xlu0 %835, %v1053_v3  }
  0x2c   : >> { %837 = vset.pattern.permute.xlu1 %v949_v18  ;;  %838 = vset.pattern.permute.xlu0 %v949_v18 }
  0x2d   : >> { %400 = vperm.xlu1 %837, %v1034_v0   ;;  %404 = vperm.xlu0 %838, %v1039_v1  }
  0x31   : >> { %408 = vperm.xlu1 %837, %v1044_v2   ;;  %839 = vset.pattern.permute.xlu0 %v950_v19 }
  0x32   : >> { %458 = vperm.xlu0 %839, %v1034_v0  }
  0x35   : >> { %412 = vperm.xlu1 %837, %v1053_v3  }
  0x36   : >> { %470 = vperm.xlu0 %839, %v1053_v3  }
  0x39   : >> { %840 = vset.pattern.permute.xlu1 %v950_v19 }
  0x3a   : >> { %462 = vperm.xlu1 %840, %v1039_v1   ;;  %842 = vset.pattern.permute.xlu0 %v947_v16 }
  0x3b   : >> { %504 = vperm.xlu0 %842, %v1069_v13  }
  0x3e   : >> { %466 = vperm.xlu1 %840, %v1044_v2  }
  0x42   : >> { %841 = vset.pattern.permute.xlu1 %v947_v16  ;;  %v1118_v16 = vrot.slane %v446_v55, %v441_v40 }
  0x43   : >> { %499 = vperm.xlu1 %841, %v1067_v12  }
  0x47   : >> { %509 = vperm.xlu1 %841, %v1071_v14  }
  0x4b   : >> { %514 = vperm.xlu1 %841, %v1078_v15  }
  0x9a   : >> { %v292_v22 = vpop.permute.xlu1 %291  ;;  %v282_v23 = vpop.permute.xlu0 %281 }
  0x9b   : >> { %v303_v45 = vsub.f32 %v274_v35, %v292_v22  ;;  %v304_v53 = vsub.f32 %v278_v41, %v292_v22  ;;  %v299_v54 = vsub.f32 %v274_v35, %v282_v23  ;;  %v300_v57 = vsub.f32 %v278_v41, %v282_v23 }
  0x9d   : >> { %v311_v56 = vand.u32 2147483647, %v303_v45  ;;  %v312_v9 = vand.u32 2147483647, %v304_v53  ;;  %v307_v10 = vand.u32 2147483647, %v299_v54 }
  0x9e   : >> { %v297_v26 = vpop.permute.xlu1 %296  ;;  %v287_v27 = vpop.permute.xlu0 %286  ;;  %v308_v18 = vand.u32 2147483647, %v300_v57 }
  0x9f   : >> { %v301_v47 = vsub.f32 %v274_v35, %v287_v27  ;;  %v302_v49 = vsub.f32 %v278_v41, %v287_v27  ;;  %v305_v60 = vsub.f32 %v274_v35, %v297_v26  ;;  %v306_v61 = vsub.f32 %v278_v41, %v297_v26 }
  0xa0   : >> { %v319_v17 = vadd.f32 1.0, %v311_v56  ;;  %v315_v30 = vadd.f32 1.0, %v307_v10  ;;  %v316_v36 = vadd.f32 1.0, %v308_v18  ;;  %v320_v40 = vadd.f32 1.0, %v312_v9 }
  0xa1   : >> { %v309_v62 = vand.u32 2147483647, %v301_v47  ;;  %v310_v5 = vand.u32 2147483647, %v302_v49  ;;  %v313_v22 = vand.u32 2147483647, %v305_v60 }
  0xa2   : >> { %v314_v23 = vand.u32 2147483647, %v306_v61 }
  0xa3   : >> { %v347_v33 = vpop.permute.xlu1 %346  ;;  %v343_v34 = vpop.permute.xlu0 %342  ;;  %v317_v24 = vadd.f32 1.0, %v309_v62  ;;  %v318_v26 = vadd.f32 1.0, %v310_v5  ;;  %v321_v41 = vadd.f32 1.0, %v313_v22 }
  0xa4   : >> { %v359_v6 = vsub.f32 %v336_v50, %v347_v33  ;;  %v360_v7 = vsub.f32 %v340_v51, %v347_v33  ;;  %v357_v11 = vsub.f32 %v336_v50, %v343_v34  ;;  %v358_v19 = vsub.f32 %v340_v51, %v343_v34 }
  0xa6   : >> { %v367_v27 = vand.u32 2147483647, %v359_v6  ;;  %v368_v28 = vand.u32 2147483647, %v360_v7  ;;  %v365_v31 = vand.u32 2147483647, %v357_v11 }
  0xa7   : >> { %v351_v42 = vpop.permute.xlu1 %350  ;;  %v1108_v43 = vpop.permute.xlu0 %354  ;;  %v366_v34 = vand.u32 2147483647, %v358_v19 }
  0xa8   : >> { %v361_v20 = vsub.f32 %v336_v50, %v351_v42  ;;  %v362_v25 = vsub.f32 %v340_v51, %v351_v42  ;;  %v363_v29 = vsub.f32 %v336_v50, %v1108_v43  ;;  %v364_v38 = vsub.f32 %v340_v51, %v1108_v43 }
  0xa9   : >> { %v322_v42 = vadd.f32 1.0, %v314_v23  ;;  %v375_v45 = vadd.f32 %v367_v27, %v317_v24  ;;  %v376_v46 = vadd.f32 %v368_v28, %v318_v26  ;;  %v373_v49 = vadd.f32 %v365_v31, %v315_v30 }
  0xaa   : >> { %v369_v37 = vand.u32 2147483647, %v361_v20  ;;  %v370_v44 = vand.u32 2147483647, %v362_v25  ;;  %v371_v47 = vand.u32 2147483647, %v363_v29  ;;  %v374_v54 = vadd.f32 %v366_v34, %v316_v36 }
  0xab   : >> { %v372_v43 = vand.u32 2147483647, %v364_v38 }
  0xac   : >> { %v1110_v58 = vpop.permute.xlu1 %400  ;;  %v405_v4 = vpop.permute.xlu0 %404  ;;  %v377_v55 = vadd.f32 %v369_v37, %v319_v17  ;;  %v378_v56 = vadd.f32 %v370_v44, %v320_v40  ;;  %v379_v5 = vadd.f32 %v371_v47, %v321_v41 }
  0xad   : >> { %v417_v32 = vsub.f32 %v1112_v59, %v405_v4  ;;  %v418_v33 = vsub.f32 %v1114_v63, %v405_v4  ;;  %v415_v48 = vsub.f32 %v1112_v59, %v1110_v58  ;;  %v416_v50 = vsub.f32 %v1114_v63, %v1110_v58 }
  0xae   : >> { %v380_v22 = vadd.f32 %v372_v43, %v322_v42 }
  0xaf   : >> { %v425_v52 = vand.u32 2147483647, %v417_v32  ;;  %v426_v53 = vand.u32 2147483647, %v418_v33  ;;  %v423_v6 = vand.u32 2147483647, %v415_v48 }
  0xb0   : >> { %v409_v21 = vpop.permute.xlu1 %408  ;;  %v424_v9 = vand.u32 2147483647, %v416_v50 }
  0xb1   : >> { %v459_v35 = vpop.permute.xlu0 %458  ;;  %v419_v51 = vsub.f32 %v1112_v59, %v409_v21  ;;  %v420_v57 = vsub.f32 %v1114_v63, %v409_v21  ;;  %v433_v10 = vadd.f32 %v425_v52, %v375_v45  ;;  %v434_v11 = vadd.f32 %v426_v53, %v376_v46 }
  0xb2   : >> { %v473_v60 = vsub.f32 %v1116_v8, %v459_v35  ;;  %v474_v61 = vsub.f32 %v1118_v16, %v459_v35  ;;  %v432_v32 = vadd.f32 %v424_v9, %v374_v54 }
  0xb3   : >> { %v427_v18 = vand.u32 2147483647, %v419_v51  ;;  %v428_v23 = vand.u32 2147483647, %v420_v57 }
  0xb4   : >> { %v413_v39 = vpop.permute.xlu1 %412  ;;  %v481_v24 = vand.u32 2147483647, %v473_v60  ;;  %v482_v25 = vand.u32 2147483647, %v474_v61 }
  0xb5   : >> { %v471_v62 = vpop.permute.xlu0 %470  ;;  %v421_v17 = vsub.f32 %v1112_v59, %v413_v39  ;;  %v422_v19 = vsub.f32 %v1114_v63, %v413_v39  ;;  %v431_v59 = vadd.f32 %v423_v6, %v373_v49  ;;  %v435_v42 = vadd.f32 %v427_v18, %v377_v55 }
  0xb6   : >> { %v479_v63 = vsub.f32 %v1116_v8, %v471_v62  ;;  %v480_v36 = vsub.f32 %v1118_v16, %v471_v62  ;;  %v1148_v39 = vadd.f32 %v482_v25, %v432_v32  ;;  %v436_v44 = vadd.f32 %v428_v23, %v378_v56 }
  0xb7   : >> { %v429_v33 = vand.u32 2147483647, %v421_v17  ;;  %v430_v35 = vand.u32 2147483647, %v422_v19  ;;  %v1146_v38 = vadd.f32 %v481_v24, %v431_v59 }
  0xb8   : >> { %v488_v52 = vand.u32 2147483647, %v480_v36 }
  0xb9   : >> { %v463_v4 = vpop.permute.xlu1 %462  ;;  %v437_v48 = vadd.f32 %v429_v33, %v379_v5  ;;  %v438_v50 = vadd.f32 %v430_v35, %v380_v22 }
  0xba   : >> { %v475_v58 = vsub.f32 %v1116_v8, %v463_v4  ;;  %v476_v7 = vsub.f32 %v1118_v16, %v463_v4  ;;  %v505_v27 = vpop.permute.xlu0 %504 }
  0xbc   : >> { %v483_v20 = vand.u32 2147483647, %v475_v58  ;;  %v484_v21 = vand.u32 2147483647, %v476_v7  ;;  %v1164_v7 = vadd.f32 %v488_v52, %v438_v50 }
  0xbd   : >> { %v467_v26 = vpop.permute.xlu1 %466 }
  0xbe   : >> { %v1136_v28 = vadd.f32 %v483_v20, %v433_v10  ;;  %v1138_v29 = vadd.f32 %v484_v21, %v434_v11  ;;  %v477_v30 = vsub.f32 %v1116_v8, %v467_v26  ;;  %v478_v31 = vsub.f32 %v1118_v16, %v467_v26 }
  0xbf   : >> { %v487_v8 = vand.u32 2147483647, %v479_v63 }
  0xc0   : >> { %v519_v34 = vsub.f32 %v505_v27, %v1136_v28  ;;  %v520_v37 = vsub.f32 %v505_v27, %v1138_v29  ;;  %v485_v40 = vand.u32 2147483647, %v477_v30  ;;  %v486_v41 = vand.u32 2147483647, %v478_v31 }
  0xc1   : >> { %v1162_v58 = vadd.f32 %v487_v8, %v437_v48 }
  0xc2   : >> { %v527_v45 = vand.u32 2147483647, %v519_v34  ;;  %v528_v46 = vand.u32 2147483647, %v520_v37  ;;  %v500_v47 = vpop.permute.xlu1 %499  ;;  %v1152_v43 = vadd.f32 %v485_v40, %v435_v42  ;;  %v1154_v51 = vadd.f32 %v486_v41, %v436_v44 }
  0xc3   : >> { %v517_v49 = vsub.f32 %v500_v47, %v1146_v38  ;;  %v518_v16 = vsub.f32 %v500_v47, %v1148_v39 }
  0xc4   : >> { %v535_v53 = vadd.f32 1.0, %v527_v45  ;;  %v536_v54 = vadd.f32 1.0, %v528_v46 }
  0xc5   : >> { %v525_v57 = vand.u32 2147483647, %v517_v49  ;;  %v526_v55 = vand.u32 2147483647, %v518_v16 }
  0xc6   : >> { %v551_v56 = vmul.f32 %v535_v53, %v1136_v28  ;;  %v552_v60 = vmul.f32 %v536_v54, %v1138_v29  ;;  %v510_v61 = vpop.permute.xlu1 %509  ;;  %v543_v42 = vsub.f32 %v535_v53, %v1136_v28  ;;  %v544_v46 = vsub.f32 %v536_v54, %v1138_v29 }
  0xc7   : >> { %v533_v62 = vadd.f32 1.0, %v525_v57  ;;  %v1158_v4 = vadd.f32 1.0, %v526_v55  ;;  %v521_v5 = vsub.f32 %v510_v61, %v1152_v43  ;;  %v522_v6 = vsub.f32 %v510_v61, %v1154_v51 }
  0xc8   : >> { %843 = vrcp.f32 %v551_v56 }
  0xc9   : >> { %845 = vrcp.f32 %v552_v60  ;;  %v549_v9 = vmul.f32 %v533_v62, %v1146_v38  ;;  %v550_v10 = vmul.f32 %v1158_v4, %v1148_v39  ;;  %v529_v11 = vand.u32 2147483647, %v521_v5 }
  0xca   : >> { %v530_v17 = vand.u32 2147483647, %v522_v6  ;;  %v515_v18 = vpop.permute.xlu1 %514  ;;  %v541_v52 = vsub.f32 %v533_v62, %v1146_v38  ;;  %v542_v29 = vsub.f32 %v1158_v4, %v1148_v39 }
  0xcb   : >> { %847 = vrcp.f32 %v549_v9  ;;  %v523_v19 = vsub.f32 %v515_v18, %v1162_v58  ;;  %v524_v20 = vsub.f32 %v515_v18, %v1164_v7  ;;  %v537_v21 = vadd.f32 1.0, %v529_v11 }
  0xcc   : >> { %849 = vrcp.f32 %v550_v10  ;;  %v538_v22 = vadd.f32 1.0, %v530_v17 }
  0xcd   : >> { %v531_v23 = vand.u32 2147483647, %v523_v19  ;;  %v532_v24 = vand.u32 2147483647, %v524_v20  ;;  %v553_v25 = vmul.f32 %v537_v21, %v1152_v43  ;;  %v545_v62 = vsub.f32 %v537_v21, %v1152_v43 }
  0xce   : >> { %v554_v26 = vmul.f32 %v538_v22, %v1154_v51  ;;  %v546_v4 = vsub.f32 %v538_v22, %v1154_v51 }
  0xcf   : >> { %v1173_v27 = vadd.f32 1.0, %v531_v23  ;;  %v1175_v30 = vadd.f32 1.0, %v532_v24  ;;  %851 = vrcp.f32 %v553_v25 }
  0xd0   : >> { %853 = vrcp.f32 %v554_v26 }
  0xd1   : >> { %v555_v31 = vmul.f32 %v1173_v27, %v1162_v58  ;;  %v556_v32 = vmul.f32 %v1175_v30, %v1164_v7  ;;  %v547_v23 = vsub.f32 %v1173_v27, %v1162_v58 }
  0xd2   : >> { %v844_v59 = vpop.eup %843 }
  0xd3   : >> { %v846_v33 = vpop.eup %845  ;;  %v567_v63 = vmul.f32 %v844_v59, %v551_v56  ;;  %855 = vrcp.f32 %v555_v31 }
  0xd4   : >> { %v568_v35 = vmul.f32 %v846_v33, %v552_v60  ;;  %857 = vrcp.f32 %v556_v32 }
  0xd5   : >> { %v848_v36 = vpop.eup %847  ;;  %v575_v34 = vsub.f32 2.0, %v567_v63 }
  0xd6   : >> { %v850_v37 = vpop.eup %849  ;;  %v576_v40 = vsub.f32 2.0, %v568_v35  ;;  %v565_v41 = vmul.f32 %v848_v36, %v549_v9 }
  0xd7   : >> { %v583_v44 = vmul.f32 %v844_v59, %v575_v34  ;;  %v566_v45 = vmul.f32 %v850_v37, %v550_v10 }
  0xd8   : >> { %v584_v47 = vmul.f32 %v846_v33, %v576_v40  ;;  %v573_v48 = vsub.f32 2.0, %v565_v41 }
  0xd9   : >> { %v591_v8 = vmul.f32 %v583_v44, %v543_v42  ;;  %v574_v49 = vsub.f32 2.0, %v566_v45  ;;  %v852_v16 = vpop.eup %851 }
  0xda   : >> { %v592_v50 = vmul.f32 %v584_v47, %v544_v46  ;;  %v581_v57 = vmul.f32 %v848_v36, %v573_v48  ;;  %v854_v28 = vpop.eup %853  ;;  %v569_v54 = vmul.f32 %v852_v16, %v553_v25  ;;  %v548_v25 = vsub.f32 %v1175_v30, %v1164_v7 }
  0xdb   : >> { %602 = vst [vmem:[%s1186_s18 + $0x10] sm:$0xff] %v591_v8  ;;  %v582_v53 = vmul.f32 %v850_v37, %v574_v49  ;;  %v570_v56 = vmul.f32 %v854_v28, %v554_v26 }
  0xdc   : >> { %603 = vst [vmem:[%s1186_s18 + $0x18] sm:$0xff] %v592_v50  ;;  %v589_v55 = vmul.f32 %v581_v57, %v541_v52  ;;  %v577_v5 = vsub.f32 2.0, %v569_v54 }
  0xdd   : >> { %v856_v60 = vpop.eup %855  ;;  %v590_v61 = vmul.f32 %v582_v53, %v542_v29  ;;  %v578_v9 = vsub.f32 2.0, %v570_v56 }
  0xde   : >> { %v858_v6 = vpop.eup %857  ;;  %600 = vst [vmem:[%s1186_s18] sm:$0xff] %v589_v55  ;;  %v571_v38 = vmul.f32 %v856_v60, %v555_v31  ;;  %v585_v10 = vmul.f32 %v852_v16, %v577_v5 }
  0xdf   : >> { %601 = vst [vmem:[%s1186_s18 + $0x8] sm:$0xff] %v590_v61  ;;  %v572_v39 = vmul.f32 %v858_v6, %v556_v32  ;;  %v586_v11 = vmul.f32 %v854_v28, %v578_v9 }
  0xe0   : >> { %v579_v17 = vsub.f32 2.0, %v571_v38  ;;  %v593_v18 = vmul.f32 %v585_v10, %v545_v62 }
  0xe1   : >> { %v580_v19 = vsub.f32 2.0, %v572_v39  ;;  %v594_v20 = vmul.f32 %v586_v11, %v546_v4  ;;  %254 = sbr.rel (!%p252_p12) target bundleno = 25 (0x19), region = 82 }
  0xe2   : >> { %v587_v24 = vmul.f32 %v856_v60, %v579_v17  ;;  %604 = vst [vmem:[%s1186_s18 + $0x20] sm:$0xff] %v593_v18 }
  0xe3   : >> { %v588_v43 = vmul.f32 %v858_v6, %v580_v19  ;;  %605 = vst [vmem:[%s1186_s18 + $0x28] sm:$0xff] %v594_v20 }
  0xe4   : >> { %v595_v21 = vmul.f32 %v587_v24, %v547_v23 }
  0xe5   : >> { %v596_v26 = vmul.f32 %v588_v43, %v548_v25 }
  0xe6   : >> { %606 = vst [vmem:[%s1186_s18 + $0x30] sm:$0xff] %v595_v21 }
  0xe7   : >> { %607 = vst [vmem:[%s1186_s18 + $0x38] sm:$0xff] %v596_v26 }
  0xe8   : > { %872 = shalt.err (!%p869_p6)
}
  0xe9   : > { %s873_s26 = scalar_lea.hbm %s1212_s28, 2048  ;;  %s877_s9 = scalar_lea.hbm %s1269_s3, 4096 }
  0xea   : > { %p874_p7 = scmp.ne.s32.totalorder %s1212_s28, %s873_s26  ;;  %p878_p11 = scmp.lt.u32.totalorder %s1212_s28, %s1269_s3 }
  0xeb   : > { %p879_p12 = scmp.lt.u32.totalorder %s877_s9, %s873_s26  ;;  %p881_p0 = scmp.lt.u32.totalorder %s873_s26, %s1212_s28 }
  0xec   : > { %p875_p9 = pnand %p874_p7, %p1014_p4 }
  0xed   : > { %p880_p13 = por %p879_p12, %p878_p11 }
  0xee   : > { %p876_p10 = pneg %p875_p9 }
  0xef   : > { %p882_p1 = por %p881_p0, %p880_p13 }
  0xf1   : > { %p883_p2 = pnand %p882_p1, %p876_p10 }
  0xf3   : > { %886 = shalt.err (!%p883_p2)
}
  0xf4   : > { %s952_s11 = smov 256   ;;  %s953_s18 = smov 16  }
  0xf5   : > { %764 = dma.vmem_to_hbm [thread:$0]  (%p1014_p4), %s1216_s29, 2048, %s1212_s28, %s1220_s30, %s952_s11, %s952_s11, %s953_s18  }
  0xf6 PF: > { %p770_p3 = scmp.ge.s32.totalorder %s941_s17, 2  ;;  %s641_s19 = sand.u32 1, %s921_s12  }
  0xf7   : > { %s642_s21 = scalar_lea.sflag [#allocation3], %s641_s19 }
  0xf8   : > { %p767_p5 = pnand %p770_p3, %p1021_p8 }
  0xfa   : > { %916 = dma.done.wait (!%p767_p5), %s642_s21, 2048  }
  0xfb   : > { %918 = vsyncadd (!%p767_p5), %s642_s21, 4294965248  ;;  %s16_s17 = sadd.s32 1, %s941_s17   ;;  %s1272_s12 = smov %s925_s13 }
  0xfc   : > { %p13_p6 = scmp.ge.s32.totalorder %s16_s17, 4   ;;  %s1273_s13 = smov %s929_s14 }
  0xfd   : > { %s1274_s14 = smov %s1027_s25  ;;  %s1275_s15 = smov %s937_s16 }
  0xfe   : > { %s1276_s16 = smov %s1278_s20  ;;  %15 = sbr.rel (!%p13_p6) target bundleno = 4 (0x4), region = 93 }
 0x105   :  { %647 = vsyncpa [#allocation3], 1 }
 0x106   :  { %649 = vsyncpa [#allocation3 + $0x1], 1 }

</bundles_post_ra>
